<compile_context>
chip_gen: v5e
topology: v5e:2x2
jax: 0.10.0
libtpu: 0.0.40
codegen_flags: <defaults>
</compile_context>

<pallas_src>
import functools

import jax
import jax.numpy as jnp
from jax import lax
from jax.experimental import pallas as pl
from jax.experimental.pallas import tpu as pltpu


def _fusion_kernel(x1_ref, x2_ref, pw_ref, wq_ref, wk_ref, wv_ref, o_ref,
                   *, Bt, C1, C2, H, W, K):
    """One grid step processes Bt batches.

    x1_ref : (Bt, C1*H, K)  rows ordered (channel, out-row); K = h2*W1 (pooled-away
                            image rows merged into the lane dim)
    x2_ref : (Bt, C2, H*W)
    pw_ref : (K, W)         block-mean pooling matrix, pre-scaled by 1/(h2*w2)
    wq_ref : (C2, C2) ; wk_ref, wv_ref : (C1, C1)   1x1-conv weights
    o_ref  : (Bt, C2, H*W)
    """
    f32 = jnp.float32

    # ---- 2-D block-mean pooling of x1 down to the x2 grid: one small MXU matmul ----
    x1m = x1_ref[...].astype(f32).reshape(Bt * C1 * H, K)
    cp = jnp.dot(x1m, pw_ref[...], preferred_element_type=f32)        # (Bt*C1*H, W)
    cp3 = cp.reshape(Bt * C1, H, W)
    # lane-concatenate the H row pieces -> flat (h*W + w) spatial index
    x1p = jnp.concatenate([cp3[:, h, :] for h in range(H)], axis=-1)  # (Bt*C1, H*W)

    wq = wq_ref[...].astype(f32)
    wk = wk_ref[...].astype(f32)
    wv = wv_ref[...].astype(f32)
    inv_h = 1.0 / float(H)                                            # compile-time const

    for b in range(Bt):                                               # unrolled, Bt small
        x1p_b = x1p[b * C1:(b + 1) * C1, :]                           # (C1, HW)
        x2_b = x2_ref[b].astype(f32)                                  # (C2, HW)

        # 1x1 convolutions == channel matmuls (channel-major; no transposes)
        k1 = jnp.dot(wk, x1p_b, preferred_element_type=f32)           # (C1, HW)
        v1 = jnp.dot(wv, x1p_b, preferred_element_type=f32)           # (C1, HW)
        q2 = jnp.dot(wq, x2_b, preferred_element_type=f32)            # (C2, HW)

        # channel-attention scores: contract the spatial axis directly (q2 @ k1^T)
        scores = lax.dot_general(
            q2, k1, dimension_numbers=(((1,), (1,)), ((), ())),
            preferred_element_type=f32) * inv_h                       # (C2, C1)

        # numerically-stable softmax over C1
        scores = scores - jnp.max(scores, axis=-1, keepdims=True)
        e = jnp.exp(scores)
        denom = jnp.sum(e, axis=-1, keepdims=True)
        attn = e * pl.reciprocal(denom, approx=False)

        out_b = jnp.dot(attn, v1, preferred_element_type=f32)         # (C2, HW)
        o_ref[b] = (x2_b + out_b).astype(o_ref.dtype)                 # residual + store


def _choose_batch_tile(B):
    # Fold batches for larger B, but keep >= 2 grid steps when possible (megacore).
    for cand in (8, 4, 2):
        if B % cand == 0 and B // cand >= 2:
            return cand
    return 1


def cross_view_fusion(x1, x2, wq, wk, wv, *, batch_tile=None):
    """x1: (B, C1, H1, W1), x2: (B, C2, H, W), NCHW float32. Returns (B, C2, H, W)."""
    B, C1, H1, W1 = x1.shape
    B2, C2, H, W = x2.shape
    assert B == B2 and H1 % H == 0 and W1 % W == 0
    h2, w2 = H1 // H, W1 // W
    HW = H * W
    K = h2 * W1

    Bt = _choose_batch_tile(B) if batch_tile is None else batch_tile
    assert B % Bt == 0

    # (K, W) block-mean pooling matrix; the full 1/(h2*w2) mean scale is folded in.
    cols = jnp.arange(K) % W1
    pw = ((cols[:, None] // w2) == jnp.arange(W)[None, :]).astype(jnp.float32)
    pw = pw / float(h2 * w2)

    # Free (contiguous) views: merging (C1,H) and (h2,W1) turns the whole 2-D block
    # mean into a single (.., K) @ (K, W) matmul inside the kernel.
    x1_merged = x1.reshape(B, C1 * H, K)
    x2_flat = x2.reshape(B, C2, HW)

    kernel = functools.partial(_fusion_kernel, Bt=Bt, C1=C1, C2=C2, H=H, W=W, K=K)

    out_flat = pl.pallas_call(
        kernel,
        out_shape=jax.ShapeDtypeStruct((B, C2, HW), x2.dtype),
        grid_spec=pltpu.PrefetchScalarGridSpec(
            num_scalar_prefetch=0,
            grid=(B // Bt,),
            in_specs=[
                pl.BlockSpec((Bt, C1 * H, K), lambda b: (b, 0, 0)),   # x1 (merged rows)
                pl.BlockSpec((Bt, C2, HW), lambda b: (b, 0, 0)),      # x2 (spatial flat)
                pl.BlockSpec((K, W), lambda b: (0, 0)),               # pooling matrix
                pl.BlockSpec((C2, C2), lambda b: (0, 0)),             # Wq
                pl.BlockSpec((C1, C1), lambda b: (0, 0)),             # Wk
                pl.BlockSpec((C1, C1), lambda b: (0, 0)),             # Wv
            ],
            out_specs=pl.BlockSpec((Bt, C2, HW), lambda b: (b, 0, 0)),
        ),
        compiler_params=pltpu.CompilerParams(
            dimension_semantics=("parallel",),
            vmem_limit_bytes=32 * 1024 * 1024,
        ),
    )(x1_merged, x2_flat, pw, wq, wk, wv)

    return out_flat.reshape(B, C2, H, W)


def reference(x1, x2, wq, wk, wv):
    """Pure-JAX reference mirroring the PyTorch forward."""
    B, C1, H1, W1 = x1.shape
    _, C2, H, W = x2.shape
    x1p = x1.reshape(B, C1, H, H1 // H, W, W1 // W).mean(axis=(3, 5))   # (B,C1,H,W)
    k1 = jnp.einsum('oc,bchw->bohw', wk, x1p).reshape(B, C1, H * W)
    v1 = jnp.einsum('oc,bchw->bohw', wv, x1p).reshape(B, C1, H * W)
    q2 = jnp.einsum('oc,bchw->bohw', wq, x2).reshape(B, C2, H * W)
    attn = jnp.einsum('bqs,bks->bqk', q2, k1) / H                       # (B,C2,C1)
    attn = jax.nn.softmax(attn, axis=-1)
    out = jnp.einsum('bqk,bks->bqs', attn, v1).reshape(B, C2, H, W)
    return x2 + out


if __name__ == "__main__":
    # Small deterministic example: x1shape=(8,16,16), x2shape=(8,8,8), batch=2.
    B, C1, H1, W1 = 2, 8, 16, 16
    C2, H, W = 8, 8, 8

    key = jax.random.PRNGKey(0)
    k_x1, k_x2, k_q, k_k, k_v = jax.random.split(key, 5)
    x1 = jax.random.normal(k_x1, (B, C1, H1, W1), dtype=jnp.float32)
    x2 = jax.random.normal(k_x2, (B, C2, H, W), dtype=jnp.float32)
    # 1x1 conv weights (C_out, C_in), deterministic init (kaiming-ish scale).
    wq = jax.random.normal(k_q, (C2, C2), dtype=jnp.float32) / jnp.sqrt(C2)
    wk = jax.random.normal(k_k, (C1, C1), dtype=jnp.float32) / jnp.sqrt(C1)
    wv = jax.random.normal(k_v, (C1, C1), dtype=jnp.float32) / jnp.sqrt(C1)

    out = cross_view_fusion(x1, x2, wq, wk, wv)
    out = jax.block_until_ready(out)

    ref = reference(x1, x2, wq, wk, wv)
    assert out.shape == (B, C2, H, W)
    assert jnp.allclose(out, ref, atol=1e-3, rtol=1e-3), "mismatch vs pure-JAX reference"

    print("KERNEL_OK")
</pallas_src>

<mosaic_0001>
module attributes {stable_mosaic.version = 11 : i64} {
  func.func @_fusion_kernel(%arg0: i32, %arg1: memref<1x64x32xf32, #tpu.memory_space<vmem>>, %arg2: memref<1x8x64xf32, #tpu.memory_space<vmem>>, %arg3: memref<32x8xf32, #tpu.memory_space<vmem>>, %arg4: memref<8x8xf32, #tpu.memory_space<vmem>>, %arg5: memref<8x8xf32, #tpu.memory_space<vmem>>, %arg6: memref<8x8xf32, #tpu.memory_space<vmem>>, %arg7: memref<1x8x64xf32, #tpu.memory_space<vmem>>) attributes {dimension_semantics = [#tpu.dimension_semantics<parallel>], iteration_bounds = array<i64: 2>, scalar_prefetch = 0 : i64, scratch_operands = 0 : i64, tpu.core_type = #tpu.core_type<tc>, window_params = [{transform_indices = @transform_0, window_bounds = array<i64: 1, 64, 32>}, {transform_indices = @transform_1, window_bounds = array<i64: 1, 8, 64>}, {pipeline_mode = #tpu.pipeline_mode<synchronous>, transform_indices = @transform_2, window_bounds = array<i64: 32, 8>}, {pipeline_mode = #tpu.pipeline_mode<synchronous>, transform_indices = @transform_3, window_bounds = array<i64: 8, 8>}, {pipeline_mode = #tpu.pipeline_mode<synchronous>, transform_indices = @transform_4, window_bounds = array<i64: 8, 8>}, {pipeline_mode = #tpu.pipeline_mode<synchronous>, transform_indices = @transform_5, window_bounds = array<i64: 8, 8>}, {transform_indices = @transform_6, window_bounds = array<i64: 1, 8, 64>}]} {
    %c0 = arith.constant 0 : index
    %c0_0 = arith.constant 0 : index
    %c0_1 = arith.constant 0 : index
    %0 = vector.load %arg1[%c0, %c0_0, %c0_1] : memref<1x64x32xf32, #tpu.memory_space<vmem>>, vector<1x64x32xf32>
    %1 = vector.shape_cast %0 : vector<1x64x32xf32> to vector<64x32xf32>
    %c0_2 = arith.constant 0 : index
    %c0_3 = arith.constant 0 : index
    %2 = vector.load %arg3[%c0_2, %c0_3] : memref<32x8xf32, #tpu.memory_space<vmem>>, vector<32x8xf32>
    %cst = arith.constant dense<0.000000e+00> : vector<64x8xf32>
    %3 = tpu.matmul %1, %2, %cst {dimension_numbers = #tpu.dot_dimension_numbers<[1], [0], [0], [1], [0, 0, 1, 1], [], []>} : vector<64x32xf32>, vector<32x8xf32>, vector<64x8xf32> -> vector<64x8xf32>
    %4 = vector.shape_cast %3 : vector<64x8xf32> to vector<8x8x8xf32>
    %5 = vector.extract_strided_slice %4 {offsets = [0, 0, 0], sizes = [8, 1, 8], strides = [1, 1, 1]} : vector<8x8x8xf32> to vector<8x1x8xf32>
    %6 = vector.shape_cast %5 : vector<8x1x8xf32> to vector<8x8xf32>
    %7 = vector.extract_strided_slice %4 {offsets = [0, 1, 0], sizes = [8, 1, 8], strides = [1, 1, 1]} : vector<8x8x8xf32> to vector<8x1x8xf32>
    %8 = vector.shape_cast %7 : vector<8x1x8xf32> to vector<8x8xf32>
    %9 = vector.extract_strided_slice %4 {offsets = [0, 2, 0], sizes = [8, 1, 8], strides = [1, 1, 1]} : vector<8x8x8xf32> to vector<8x1x8xf32>
    %10 = vector.shape_cast %9 : vector<8x1x8xf32> to vector<8x8xf32>
    %11 = vector.extract_strided_slice %4 {offsets = [0, 3, 0], sizes = [8, 1, 8], strides = [1, 1, 1]} : vector<8x8x8xf32> to vector<8x1x8xf32>
    %12 = vector.shape_cast %11 : vector<8x1x8xf32> to vector<8x8xf32>
    %13 = vector.extract_strided_slice %4 {offsets = [0, 4, 0], sizes = [8, 1, 8], strides = [1, 1, 1]} : vector<8x8x8xf32> to vector<8x1x8xf32>
    %14 = vector.shape_cast %13 : vector<8x1x8xf32> to vector<8x8xf32>
    %15 = vector.extract_strided_slice %4 {offsets = [0, 5, 0], sizes = [8, 1, 8], strides = [1, 1, 1]} : vector<8x8x8xf32> to vector<8x1x8xf32>
    %16 = vector.shape_cast %15 : vector<8x1x8xf32> to vector<8x8xf32>
    %17 = vector.extract_strided_slice %4 {offsets = [0, 6, 0], sizes = [8, 1, 8], strides = [1, 1, 1]} : vector<8x8x8xf32> to vector<8x1x8xf32>
    %18 = vector.shape_cast %17 : vector<8x1x8xf32> to vector<8x8xf32>
    %19 = vector.extract_strided_slice %4 {offsets = [0, 7, 0], sizes = [8, 1, 8], strides = [1, 1, 1]} : vector<8x8x8xf32> to vector<8x1x8xf32>
    %20 = vector.shape_cast %19 : vector<8x1x8xf32> to vector<8x8xf32>
    %21 = tpu.concatenate %6, %8, %10, %12, %14, %16, %18, %20 in 1 : vector<8x8xf32>, vector<8x8xf32>, vector<8x8xf32>, vector<8x8xf32>, vector<8x8xf32>, vector<8x8xf32>, vector<8x8xf32>, vector<8x8xf32> -> vector<8x64xf32>
    %c0_4 = arith.constant 0 : index
    %c0_5 = arith.constant 0 : index
    %22 = vector.load %arg4[%c0_4, %c0_5] : memref<8x8xf32, #tpu.memory_space<vmem>>, vector<8x8xf32>
    %c0_6 = arith.constant 0 : index
    %c0_7 = arith.constant 0 : index
    %23 = vector.load %arg5[%c0_6, %c0_7] : memref<8x8xf32, #tpu.memory_space<vmem>>, vector<8x8xf32>
    %c0_8 = arith.constant 0 : index
    %c0_9 = arith.constant 0 : index
    %24 = vector.load %arg6[%c0_8, %c0_9] : memref<8x8xf32, #tpu.memory_space<vmem>>, vector<8x8xf32>
    %c0_10 = arith.constant 0 : index
    %c0_11 = arith.constant 0 : index
    %c0_12 = arith.constant 0 : index
    %25 = vector.load %arg2[%c0_10, %c0_11, %c0_12] : memref<1x8x64xf32, #tpu.memory_space<vmem>>, vector<1x8x64xf32>
    %26 = vector.shape_cast %25 : vector<1x8x64xf32> to vector<8x64xf32>
    %cst_13 = arith.constant dense<0.000000e+00> : vector<8x64xf32>
    %27 = tpu.matmul %23, %21, %cst_13 {dimension_numbers = #tpu.dot_dimension_numbers<[1], [0], [0], [1], [0, 0, 1, 1], [], []>} : vector<8x8xf32>, vector<8x64xf32>, vector<8x64xf32> -> vector<8x64xf32>
    %cst_14 = arith.constant dense<0.000000e+00> : vector<8x64xf32>
    %28 = tpu.matmul %24, %21, %cst_14 {dimension_numbers = #tpu.dot_dimension_numbers<[1], [0], [0], [1], [0, 0, 1, 1], [], []>} : vector<8x8xf32>, vector<8x64xf32>, vector<8x64xf32> -> vector<8x64xf32>
    %cst_15 = arith.constant dense<0.000000e+00> : vector<8x64xf32>
    %29 = tpu.matmul %22, %26, %cst_15 {dimension_numbers = #tpu.dot_dimension_numbers<[1], [0], [0], [1], [0, 0, 1, 1], [], []>} : vector<8x8xf32>, vector<8x64xf32>, vector<8x64xf32> -> vector<8x64xf32>
    %cst_16 = arith.constant dense<0.000000e+00> : vector<8x8xf32>
    %30 = tpu.matmul %29, %27, %cst_16 {dimension_numbers = #tpu.dot_dimension_numbers<[1], [1], [0], [0], [0, 0, 1, 0], [], []>} : vector<8x64xf32>, vector<8x64xf32>, vector<8x8xf32> -> vector<8x8xf32>
    %cst_17 = arith.constant 1.250000e-01 : f32
    %31 = vector.broadcast %cst_17 : f32 to vector<8x8xf32>
    %32 = arith.mulf %30, %31 : vector<8x8xf32>
    %cst_18 = arith.constant dense<0xFF800000> : vector<8xf32>
    %33 = vector.multi_reduction <maximumf>, %32, %cst_18 [1] : vector<8x8xf32> to vector<8xf32>
    %34 = vector.shape_cast %33 : vector<8xf32> to vector<8x1xf32>
    %35 = vector.broadcast %34 : vector<8x1xf32> to vector<8x8xf32>
    %36 = arith.subf %32, %35 : vector<8x8xf32>
    %37 = math.exp %36 : vector<8x8xf32>
    %cst_19 = arith.constant dense<0.000000e+00> : vector<8xf32>
    %38 = vector.multi_reduction <add>, %37, %cst_19 [1] : vector<8x8xf32> to vector<8xf32>
    %39 = vector.shape_cast %38 : vector<8xf32> to vector<8x1xf32>
    %40 = tpu.reciprocal %39 : vector<8x1xf32> -> vector<8x1xf32>
    %41 = vector.broadcast %40 : vector<8x1xf32> to vector<8x8xf32>
    %42 = arith.mulf %37, %41 : vector<8x8xf32>
    %cst_20 = arith.constant dense<0.000000e+00> : vector<8x64xf32>
    %43 = tpu.matmul %42, %28, %cst_20 {dimension_numbers = #tpu.dot_dimension_numbers<[1], [0], [0], [1], [0, 0, 1, 1], [], []>} : vector<8x8xf32>, vector<8x64xf32>, vector<8x64xf32> -> vector<8x64xf32>
    %44 = arith.addf %26, %43 : vector<8x64xf32>
    %c0_21 = arith.constant 0 : index
    %c0_22 = arith.constant 0 : index
    %c0_23 = arith.constant 0 : index
    %45 = vector.load %arg7[%c0_21, %c0_22, %c0_23] : memref<1x8x64xf32, #tpu.memory_space<vmem>>, vector<1x8x64xf32>
    %46 = vector.shape_cast %45 : vector<1x8x64xf32> to vector<8x64xf32>
    %47 = vector.shape_cast %44 : vector<8x64xf32> to vector<1x8x64xf32>
    tpu.vector_store %arg7[%c0_21, %c0_22, %c0_23], %47 {strides = array<i32>} : memref<1x8x64xf32, #tpu.memory_space<vmem>>, vector<1x8x64xf32>,
    return
  }
  func.func @transform_0(%arg0: i32) -> (i32, i32, i32) {
    %c0_i32 = arith.constant 0 : i32
    %c0_i32_0 = arith.constant 0 : i32
    %c0_i32_1 = arith.constant 0 : i32
    return %arg0, %c0_i32, %c0_i32_0 : i32, i32, i32
  }
  func.func @transform_1(%arg0: i32) -> (i32, i32, i32) {
    %c0_i32 = arith.constant 0 : i32
    %c0_i32_0 = arith.constant 0 : i32
    %c0_i32_1 = arith.constant 0 : i32
    return %arg0, %c0_i32, %c0_i32_0 : i32, i32, i32
  }
  func.func @transform_2(%arg0: i32) -> (i32, i32) {
    %c0_i32 = arith.constant 0 : i32
    %c0_i32_0 = arith.constant 0 : i32
    %c0_i32_1 = arith.constant 0 : i32
    return %c0_i32, %c0_i32_0 : i32, i32
  }
  func.func @transform_3(%arg0: i32) -> (i32, i32) {
    %c0_i32 = arith.constant 0 : i32
    %c0_i32_0 = arith.constant 0 : i32
    %c0_i32_1 = arith.constant 0 : i32
    return %c0_i32, %c0_i32_0 : i32, i32
  }
  func.func @transform_4(%arg0: i32) -> (i32, i32) {
    %c0_i32 = arith.constant 0 : i32
    %c0_i32_0 = arith.constant 0 : i32
    %c0_i32_1 = arith.constant 0 : i32
    return %c0_i32, %c0_i32_0 : i32, i32
  }
  func.func @transform_5(%arg0: i32) -> (i32, i32) {
    %c0_i32 = arith.constant 0 : i32
    %c0_i32_0 = arith.constant 0 : i32
    %c0_i32_1 = arith.constant 0 : i32
    return %c0_i32, %c0_i32_0 : i32, i32
  }
  func.func @transform_6(%arg0: i32) -> (i32, i32, i32) {
    %c0_i32 = arith.constant 0 : i32
    %c0_i32_0 = arith.constant 0 : i32
    %c0_i32_1 = arith.constant 0 : i32
    return %arg0, %c0_i32, %c0_i32_0 : i32, i32, i32
  }
}

</mosaic_0001>

<bundles_post_ra>
// kernel: tpu_custom_call.1
= control target key start
LH: loop header
LB: loop body
LE: loop exit
PB: predicated region body
PF: predicated region fallthrough
CT: control target
= control target key end

     0   :  { %11 = vsyncpa [#allocation3], 0  ;;  %s1204_s0 = inlined_call_operand.vmem [shape: f32[2,64,32], index: 0, kind: input, shape index: {}]   ;;  %s1205_s1 = inlined_call_operand.vmem [shape: f32[2,8,64], index: 1, kind: input, shape index: {}]   ;;  %s1206_s2 = inlined_call_operand.vmem [shape: f32[32,8], index: 2, kind: input, shape index: {}]   ;;  %s1207_s3 = inlined_call_operand.vmem [shape: f32[8,8], index: 3, kind: input, shape index: {}]   ;;  %s1208_s4 = inlined_call_operand.vmem [shape: f32[8,8], index: 4, kind: input, shape index: {}]   ;;  %s1209_s5 = inlined_call_operand.vmem [shape: f32[8,8], index: 5, kind: input, shape index: {}]   ;;  %s1210_s6 = inlined_call_operand.hbm [shape: f32[2,8,64], index: 6, kind: output, shape index: {}]  }
   0x1   :  { %13 = vsyncpa [#allocation3 + $0x1], 0  ;;  %s939_s21 = smov 0   ;;  %s941_s22 = smov 0  }
   0x2   :  { %s943_s23 = smov 0   ;;  %s945_s24 = smov 0  }
   0x3 LB: > { %s960_s25 = sadd.s32 4294967295, %s895_s24   ;;  %s744_s26 = sadd.s32 4294967294, %s895_s24   ;;  %s895_s24 = sphi %s945_s24, %s1216_s24   ;;  %s891_s23 = sphi %s943_s23, %s1215_s23   ;;  %s887_s22 = sphi %s941_s22, %s1214_s22   ;;  %s883_s21 = sphi %s939_s21, %s1213_s21  }
   0x4   : > { %s964_s27 = sadd.s32 1, %s895_s24   ;;  %s162_s28 = sadd.s32 1, %s891_s23 }
   0x5   : > { %s159_s29 = ssub.s32 %s895_s24, %s964_s27  ;;  %p172_p0 = scmp.ne.s32.totalorder %s891_s23, %s887_s22 }
   0x6   : > { %p160_p1 = scmp.eq.s32.totalorder %s159_s29, 0  ;;  %p173_p2 = scmp.eq.s32.totalorder %s960_s25, 1 }
   0x7   : > { %p178_p3 = scmp.ne.s32.totalorder %s887_s22, %s883_s21  ;;  %p179_p4 = scmp.eq.s32.totalorder %s744_s26, 1 }
   0x8   : > { %s975_s30 = scalar_select %p160_p1, %s891_s23, %s162_s28  }
   0x9   : > { %p977_p5 = por %p173_p2, %p172_p0  ;;  %p981_p6 = por %p179_p4, %p178_p3 }
   0xa   : > { %p747_p7 = scmp.ge.s32.totalorder %s895_s24, 1  ;;  %p224_p8 = scmp.lt.s32.totalorder %s895_s24, 3 }
   0xc   : > { %p225_p9 = pnand %p747_p7, %p224_p8 }
   0xd   : > { %p258_p10 = scmp.lt.s32.totalorder (!%p225_p9), %s960_s25, 1  ;;  %s897_s28 = smov (!%p225_p9), 16  }
   0xe   : > { %228 = sbr.rel (%p225_p9) target bundleno = 967 (0x3c7), region = 44  ;;  %s898_s29 = smov (!%p225_p9), 24  }
   0xf   : > { %s899_s9 = smov (!%p225_p9), 40   ;;  %s900_s10 = smov (!%p225_p9), 8  }
  0x10   : > { %s901_s11 = smov (!%p225_p9), 32   ;;  %s902_s12 = smov (!%p225_p9), 48  }
  0x11   : > { %s903_s13 = smov (!%p225_p9), 56  }
  0x13   : > { %v278_v0 = vld [vmem:[%s1206_s2 + $0x18] sm:$0xff]  ;;  %v277_v1 = vld [vmem:[%s1206_s2 + $0x10] sm:$0xff]  ;;  %v276_v2 = vld [vmem:[%s1206_s2 + $0x8] sm:$0xff]  ;;  %s998_s15 = scalar_select %p258_p10, %s960_s25, 1  ;;  %vm279_vm0 = vcmask 261120   ;;  %vm354_vm1 = vcmask 1041409  }
  0x14   : > { %316 = vmatpush.msra.mxu0 %v278_v0  ;;  %772 = vmatpush.msra.mxu2 %v278_v0  ;;  %v275_v3 = vld [vmem:[%s1206_s2] sm:$0xff]  ;;  %vm357_vm2 = vcmask 1042434   ;;  %vm360_vm3 = vcmask 1043459   ;;  %vm363_vm4 = vcmask 1044484   ;;  %vm366_vm5 = vcmask 1045509  }
  0x15   : > { %773 = vmatpush.msra.mxu3 %v278_v0  ;;  %771 = vmatpush.msra.mxu1 %v278_v0  ;;  %s770_s18 = sshll.u32 %s998_s15, 6  ;;  %vm369_vm6 = vcmask 1046534   ;;  %vm372_vm7 = vcmask 1047559   ;;  %s751_s14 = sshll.u32 %s998_s15, 3  ;;  %vm494_vm8 = vcmask 64512   ;;  %vm496_vm9 = vcmask 130048  }
  0x16   : > { %317 = vmatpush.msra.mxu0 %v277_v1  ;;  %775 = vmatpush.msra.mxu2 %v277_v1  ;;  %s262_s26 = scalar_lea.vmem %s1204_s0, %s770_s18  ;;  %s266_s18 = scalar_lea.vmem %s1205_s1, %s751_s14  ;;  %vm498_vm10 = vcmask 195584   ;;  %vm501_vm11 = vcmask 326656   ;;  %vm503_vm12 = vcmask 392192   ;;  %vm505_vm13 = vcmask 457728  }
  0x17   : > { %776 = vmatpush.msra.mxu3 %v277_v1  ;;  %774 = vmatpush.msra.mxu1 %v277_v1  ;;  %v267_v4 = vld [vmem:[%s262_s26] sm:$0xff]  ;;  %v273_v6 = vld [vmem:[%s262_s26 + $0x30] sm:$0xff]  ;;  %v270_v7 = vld [vmem:[%s262_s26 + $0x18] sm:$0xff]  ;;  %vm580_vm14 = vcmask 523264  }
  0x18   : > { %318 = vmatpush.msra.mxu0 %v276_v2  ;;  %778 = vmatpush.msra.mxu2 %v276_v2  ;;  %v271_v5 = vld [vmem:[%s262_s26 + $0x20] sm:$0xff]  ;;  %v268_v8 = vld [vmem:[%s262_s26 + $0x8] sm:$0xff]  ;;  %v274_v10 = vld [vmem:[%s262_s26 + $0x38] sm:$0xff] }
  0x19   : > { %779 = vmatpush.msra.mxu3 %v276_v2  ;;  %777 = vmatpush.msra.mxu1 %v276_v2  ;;  %v272_v9 = vld [vmem:[%s262_s26 + $0x28] sm:$0xff]  ;;  %v269_v11 = vld [vmem:[%s262_s26 + $0x10] sm:$0xff] }
  0x1a   : > { %319 = vmatpush.msra.mxu0 %v275_v3  ;;  %781 = vmatpush.msra.mxu2 %v275_v3 }
  0x1b   : > { %752 = vmatmul.msk.f32.vlgmr.msra.gmra.mxu0 %vm279_vm0, %v267_v4  ;;  %756 = vmatmul.msk.f32.vlgmr.msra.gmra.mxu2 %vm279_vm0, %v271_v5 }
  0x1c   : > { %782 = vmatpush.msra.mxu3 %v275_v3  ;;  %780 = vmatpush.msra.mxu1 %v275_v3 }
  0x1d   : > { %758 = vmatmul.msk.f32.vlgmr.msra.gmra.mxu3 %vm279_vm0, %v273_v6  ;;  %755 = vmatmul.msk.f32.vlgmr.msra.gmra.mxu1 %vm279_vm0, %v270_v7 }
  0x23   : > { %753 = vmatmul.msk.f32.gmra.mxu0 %vm279_vm0, %v268_v8  ;;  %757 = vmatmul.msk.f32.gmra.mxu2 %vm279_vm0, %v272_v9 }
  0x25   : > { %759 = vmatmul.msk.f32.gmra.mxu3 %vm279_vm0, %v274_v10 }
  0x2b   : > { %754 = vmatmul.msk.f32.gmra.mxu0 %vm279_vm0, %v269_v11 }
  0x98   : > { %v321_v12 = vpop.f32.mrf.mxu0 }
  0x99   : > { %v392_v15 = vrot.slane %v321_v12, 2  ;;  %v443_v16 = vrot.slane %v321_v12, 5  ;;  %v409_v17 = vrot.slane %v321_v12, 3  ;;  %v375_v18 = vrot.slane %v321_v12, 1 }
  0x9a   : > { %v1015_v13 = vpop.f32.mrf.mxu1  ;;  %v460_v20 = vrot.slane %v321_v12, 6  ;;  %v426_v21 = vrot.slane %v321_v12, 4  ;;  %v477_v22 = vrot.slane %v321_v12, 7 }
  0x9b   : > { %v396_v19 = vrot.slane %v1015_v13, 7  ;;  %v448_v25 = vrot.slane %v1015_v13, 2  ;;  %v379_v26 = vrot.slane %v1015_v13, 6  ;;  %v465_v27 = vrot.slane %v1015_v13, 3 }
  0x9c   : > { %v431_v28 = vrot.slane %v1015_v13, 1  ;;  %v482_v31 = vrot.slane %v1015_v13, 4  ;;  %v359_v32 = vrot.slane %v1015_v13, 5 }
  0x9e   : > { %v1017_v14 = vpop.f32.mrf.mxu2 }
  0x9f   : > { %v398_v30 = vrot.slane %v1017_v14, 6  ;;  %v450_v35 = vrot.slane %v1017_v14, 1  ;;  %v415_v36 = vrot.slane %v1017_v14, 7  ;;  %v381_v38 = vrot.slane %v1017_v14, 5 }
  0xa0   : > { %v324_v23 = vpop.f32.mrf.mxu0  ;;  %v1020_v24 = vpop.f32.mrf.mxu3  ;;  %v467_v40 = vrot.slane %v1017_v14, 2  ;;  %v484_v43 = vrot.slane %v1017_v14, 3  ;;  %v362_v44 = vrot.slane %v1017_v14, 4 }
  0xa1   : > { %v353_v29 = vrot.slane %v324_v23, 7  ;;  %v393_v33 = vrot.slane %v324_v23, 1  ;;  %v444_v34 = vrot.slane %v324_v23, 4  ;;  %v410_v37 = vrot.slane %v324_v23, 2 }
  0xa2   : > { %v461_v39 = vrot.slane %v324_v23, 5  ;;  %v427_v41 = vrot.slane %v324_v23, 3  ;;  %v478_v42 = vrot.slane %v324_v23, 6  ;;  %v402_v45 = vrot.slane %v1020_v24, 4 }
  0xa3   : > { %v453_v46 = vrot.slane %v1020_v24, 7  ;;  %v419_v47 = vrot.slane %v1020_v24, 5  ;;  %v1039_v48 = vsel %vm354_vm1, %v353_v29, %v321_v12  ;;  %v394_v50 = vsel %vm354_vm1, %v393_v33, %v392_v15 }
  0xa4   : > { %v445_v51 = vsel %vm354_vm1, %v444_v34, %v443_v16  ;;  %v376_v52 = vsel %vm354_vm1, %v324_v23, %v375_v18  ;;  %v385_v53 = vrot.slane %v1020_v24, 3  ;;  %v411_v54 = vsel %vm354_vm1, %v410_v37, %v409_v17 }
  0xa5   : > { %v462_v55 = vsel %vm354_vm1, %v461_v39, %v460_v20  ;;  %v436_v56 = vrot.slane %v1020_v24, 6  ;;  %v368_v57 = vrot.slane %v1020_v24, 2  ;;  %v428_v62 = vsel %vm354_vm1, %v427_v41, %v426_v21 }
  0xa6   : > { %v1041_v49 = vpop.f32.mrf.mxu2  ;;  %v479_v63 = vsel %vm354_vm1, %v478_v42, %v477_v22 }
  0xa7   : > { %v400_v60 = vrot.slane %v1041_v49, 5  ;;  %v417_v61 = vrot.slane %v1041_v49, 6  ;;  %v383_v3 = vrot.slane %v1041_v49, 4 }
  0xa8   : > { %v327_v58 = vpop.f32.mrf.mxu0  ;;  %v1051_v59 = vpop.f32.mrf.mxu3 }
  0xa9   : > { %v377_v0 = vrot.slane %v327_v58, 7  ;;  %v412_v1 = vrot.slane %v327_v58, 1  ;;  %v429_v2 = vrot.slane %v327_v58, 2  ;;  %v446_v4 = vrot.slane %v327_v58, 3 }
  0xaa   : > { %v463_v5 = vrot.slane %v327_v58, 4  ;;  %v480_v6 = vrot.slane %v327_v58, 5  ;;  %v395_v7 = vsel %vm357_vm2, %v327_v58, %v394_v50  ;;  %v404_v9 = vrot.slane %v1051_v59, 3 }
  0xab   : > { %v397_v8 = vsel %vm360_vm3, %v396_v19, %v395_v7  ;;  %v455_v10 = vrot.slane %v1051_v59, 6  ;;  %v413_v11 = vsel %vm357_vm2, %v412_v1, %v411_v54  ;;  %v447_v15 = vsel %vm357_vm2, %v446_v4, %v445_v51 }
  0xac   : > { %v399_v12 = vsel %vm363_vm4, %v398_v30, %v397_v8  ;;  %v414_v16 = vsel %vm360_vm3, %v1015_v13, %v413_v11  ;;  %v421_v17 = vrot.slane %v1051_v59, 4  ;;  %v449_v20 = vsel %vm360_vm3, %v448_v25, %v447_v15 }
  0xad   : > { %v401_v18 = vsel %vm366_vm5, %v400_v60, %v399_v12  ;;  %v416_v19 = vsel %vm363_vm4, %v415_v36, %v414_v16  ;;  %v378_v21 = vsel %vm357_vm2, %v377_v0, %v376_v52  ;;  %v451_v23 = vsel %vm363_vm4, %v450_v35, %v449_v20 }
  0xae   : > { %v403_v22 = vsel %vm369_vm6, %v402_v45, %v401_v18  ;;  %v418_v29 = vsel %vm366_vm5, %v417_v61, %v416_v19  ;;  %v380_v30 = vsel %vm360_vm3, %v379_v26, %v378_v21  ;;  %v452_v34 = vsel %vm366_vm5, %v1041_v49, %v451_v23  ;;  %v508_v21 = vld [vmem:[%s1208_s4] sm:$0xff] }
  0xaf   : > { %v405_v33 = vsel %vm372_vm7, %v404_v9, %v403_v22  ;;  %v420_v25 = vsel %vm369_vm6, %v419_v47, %v418_v29  ;;  %v382_v36 = vsel %vm363_vm4, %v381_v38, %v380_v30  ;;  %v356_v37 = vrot.slane %v327_v58, 6 }
  0xb0   : > { %406 = vrot.lane.b32.xlu0 %v405_v33, %s897_s28  ;;  %v454_v35 = vsel %vm369_vm6, %v453_v46, %v452_v34  ;;  %v422_v39 = vsel %vm372_vm7, %v421_v17, %v420_v25  ;;  %v384_v41 = vsel %vm366_vm5, %v383_v3, %v382_v36  ;;  %v464_v42 = vsel %vm357_vm2, %v463_v5, %v462_v55  ;;  %v509_v25 = vld [vmem:[%s1209_s5] sm:$0xff]  ;;  %s853_s28 = scalar_lea.hbm %s1210_s6, 16 }
  0xb1   : > { %v456_v26 = vsel %vm372_vm7, %v455_v10, %v454_v35  ;;  %423 = vrot.lane.b32.xlu1 %v422_v39, %s898_s29  ;;  %v469_v45 = vrot.slane %v1041_v49, 1  ;;  %v434_v47 = vrot.slane %v1041_v49, 7  ;;  %v466_v38 = vsel %vm360_vm3, %v465_v27, %v464_v42 }
  0xb2   : > { %457 = vrot.lane.b32.xlu2 %v456_v26, %s899_s9  ;;  %v430_v46 = vsel %vm357_vm2, %v429_v2, %v428_v62  ;;  %v486_v50 = vrot.slane %v1041_v49, 2  ;;  %v365_v51 = vrot.slane %v1041_v49, 3  ;;  %v386_v52 = vsel %vm369_vm6, %v385_v53, %v384_v41  ;;  %s255_s9 = sand.u32 1, %s887_s22  }
  0xb3   : > { %v468_v54 = vsel %vm363_vm4, %v467_v40, %v466_v38  ;;  %v432_v55 = vsel %vm360_vm3, %v431_v28, %v430_v46  ;;  %v481_v58 = vsel %vm357_vm2, %v480_v6, %v479_v63  ;;  %v358_v53 = vsel %vm357_vm2, %v356_v37, %v1039_v48  ;;  %s658_s19 = scalar_lea.sflag [#allocation3], %s255_s9 }
  0xb4   : > { %v470_v27 = vsel %vm366_vm5, %v469_v45, %v468_v54  ;;  %v433_v60 = vsel %vm363_vm4, %v1017_v14, %v432_v55  ;;  %v483_v49 = vsel %vm360_vm3, %v482_v31, %v481_v58  ;;  %v387_v40 = vrot.slane %v1051_v59, 2 }
  0xb5   : > { %v435_v61 = vsel %vm366_vm5, %v434_v47, %v433_v60  ;;  %v438_v28 = vrot.slane %v1051_v59, 5  ;;  %v361_v62 = vsel %vm360_vm3, %v359_v32, %v358_v53  ;;  %v471_v63 = vsel %vm369_vm6, %v1020_v24, %v470_v27 }
  0xb6   : > { %v437_v31 = vsel %vm369_vm6, %v436_v56, %v435_v61  ;;  %v485_v48 = vsel %vm363_vm4, %v484_v43, %v483_v49  ;;  %v364_v0 = vsel %vm363_vm4, %v362_v44, %v361_v62  ;;  %v388_v1 = vsel %vm372_vm7, %v387_v40, %v386_v52 }
  0xb7   : > { %v472_v13 = vrot.slane %v1051_v59, 7  ;;  %v371_v32 = vrot.slane %v1051_v59, 1  ;;  %v367_v2 = vsel %vm366_vm5, %v365_v51, %v364_v0  ;;  %v439_v56 = vsel %vm372_vm7, %v438_v28, %v437_v31 }
  0xb8   : > { %389 = vrot.lane.b32.xlu0 %v388_v1, %s900_s10  ;;  %v370_v43 = vsel %vm369_vm6, %v368_v57, %v367_v2  ;;  %v487_v44 = vsel %vm366_vm5, %v486_v50, %v485_v48  ;;  %v488_v4 = vrot.slane %v1020_v24, 1  ;;  %v1148_v57 = vld [vmem:[%s266_s18] sm:$0xff]  ;;  %s748_s10 = sshll.u32 %s255_s9, 3 }
  0xb9   : > { %v473_v14 = vsel %vm372_vm7, %v472_v13, %v471_v63  ;;  %440 = vrot.lane.b32.xlu1 %v439_v56, %s901_s11  ;;  %v373_v3 = vsel %vm372_vm7, %v371_v32, %v370_v43  ;;  %575 = vmatpush.msrb.mxu3 %v1148_v57  ;;  %v507_v24 = vld [vmem:[%s1207_s3] sm:$0xff]  ;;  %s767_s11 = sshll.u32 %s960_s25, 3  ;;  %s257_s16 = scalar_lea.vmem [#allocation2], %s748_s10 }
  0xba   : > { %474 = vrot.lane.b32.xlu2 %v473_v14, %s902_s12  ;;  %v489_v5 = vsel %vm369_vm6, %v488_v4, %v487_v44  ;;  %762 = vmatmul.msk.f32.vlgmr.msrb.gmra.mxu3 %vm494_vm8, %v507_v24  ;;  %s668_s14 = scalar_lea.hbm %s1210_s6, %s767_s11  ;;  %s670_s17 = sshll.u32 %s257_s16, 4  ;;  %s671_s17 = int_to_ptr.vmem [resolvable:$true] %s670_s17 }
  0xbb   : > { %v490_v6 = vsel %vm372_vm7, %v1051_v59, %v489_v5  ;;  %s672_s18 = sshll.u32 %s668_s14, 4  ;;  %s673_s18 = int_to_ptr.hbm [resolvable:$true] %s672_s18 }
  0xbc   : > { %s847_s20 = sshra.s32 %s673_s18, 4  ;;  %s848_s20 = int_to_ptr.hbm [resolvable:$true] %s847_s20 }
  0xbd   : > { %s849_s15 = scalar_lea.hbm %s848_s20, 8  ;;  %p854_p0 = scmp.lt.s32.totalorder %s848_s20, %s1210_s6 }
  0xbe   : > { %p850_p11 = scmp.ne.s32.totalorder %s848_s20, %s849_s15  ;;  %p855_p1 = scmp.lt.s32.totalorder %s853_s28, %s849_s15 }
  0xc0   : > { %491 = vrot.lane.b32.xlu0 %v490_v6, %s903_s13  ;;  %p851_p12 = pnand %p850_p11, %p977_p5  ;;  %p856_p2 = por %p855_p1, %p854_p0 }
  0xc2   : > { %p852_p13 = pneg %p851_p12 }
  0xc4   : > { %p857_p3 = pnand %p856_p2, %p852_p13 }
 0x10c   : > { %v458_v8 = vpop.permute.xlu2 %457 }
 0x114   : > { %v475_v18 = vpop.permute.xlu2 %474 }
 0x122   : > { %v407_v7 = vpop.permute.xlu0 %406 }
 0x123   : > { %v424_v59 = vpop.permute.xlu1 %423 }
 0x12a   : > { %v390_v9 = vpop.permute.xlu0 %389 }
 0x12b   : > { %v495_v10 = vsel %vm494_vm8, %v373_v3, %v390_v9  ;;  %v441_v11 = vpop.permute.xlu1 %440 }
 0x12c   : > { %v497_v12 = vsel %vm496_vm9, %v495_v10, %v407_v7 }
 0x12d   : > { %v499_v15 = vsel %vm498_vm10, %v497_v12, %v424_v59 }
 0x12e   : > { %v500_v16 = vsel %vm279_vm0, %v499_v15, %v441_v11 }
 0x12f   : > { %v502_v17 = vsel %vm501_vm11, %v500_v16, %v458_v8 }
 0x130   : > { %v504_v19 = vsel %vm503_vm12, %v502_v17, %v475_v18 }
 0x132   : > { %v492_v20 = vpop.permute.xlu0 %491 }
 0x133   : > { %v506_v22 = vsel %vm505_vm13, %v504_v19, %v492_v20 }
 0x134   : > { %529 = vmatpush.msrb.mxu1 %v506_v22  ;;  %552 = vmatpush.msrb.mxu2 %v506_v22 }
 0x135   : > { %760 = vmatmul.msk.f32.vlgmr.msrb.gmra.mxu1 %vm494_vm8, %v508_v21  ;;  %761 = vmatmul.msk.f32.vlgmr.msrb.gmra.mxu2 %vm494_vm8, %v509_v25 }
 0x13d   : > { %v577_v29 = vpop.f32.mrf.mxu3 }
 0x1b2   : > { %v531_v23 = vpop.f32.mrf.mxu1 }
 0x1b3   : > { %763 = vmatpush.xpose.msk.msra.mxu1 %vm580_vm14, %v531_v23 }
 0x1b6   : > { %764 = vmatmul.msk.f32.vlgmr.msra.gmra.mxu1 %vm580_vm14, %v577_v29 }
 0x1b8   : > { %v554_v26 = vpop.f32.mrf.mxu2 }
 0x1b9   : > { %650 = vmatpush.msra.mxu2 %v554_v26 }
 0x233   : > { %v604_v30 = vpop.f32.mrf.mxu1 }
 0x234   : > { %v607_v33 = vmul.f32 0.125, %v604_v30 }
 0x236   : > { %v608_v34 = vsel %vm494_vm8, %v607_v33, -inf }
 0x237   : > { %609 = vmax.xlane.f32.xlu1 %v608_v34 }
 0x2aa   : > { %v610_v36 = vpop.xlane.xlu1 %609 }
 0x2ab   : > { %v611_v37 = vsub.f32 %v607_v33, %v610_v36 }
 0x2ad   : > { %v612_v35 = vmul.f32 1.442695, %v611_v37 }
 0x2af   : > { %829 = vpow2.f32 %v612_v35 }
 0x2b5   : > { %v830_v39 = vpop.eup %829 }
 0x2b6   : > { %v614_v41 = vsel %vm494_vm8, %v830_v39, 0.0 }
 0x2b7   : > { %615 = vadd.xlane.f32.xlu2 %v614_v41 }
 0x32a   : > { %v616_v42 = vpop.xlane.xlu2 %615 }
 0x32b   : > { %831 = vrcp.f32 %v616_v42  ;;  %v628_v46 = vand.u32 2147483648, %v616_v42  ;;  %v626_v51 = vand.u32 2147483647, %v616_v42  ;;  %vm622_vm0 = vweird.f32 %v616_v42 }
 0x32d   : > { %v629_v54 = vor.u32 1.1754944e-38, %v628_v46  ;;  %vm627_vm2 = vcmp.eq.f32.partialorder %v626_v51, 8.507059e+37 }
 0x331   : > { %v832_v45 = vpop.eup %831 }
 0x332   : > { %v618_v47 = vmul.f32 %v832_v45, %v616_v42  ;;  %vm623_vm15 = vweird.f32 %v832_v45 }
 0x333   : > { %vm624_vm1 = vmor %vm622_vm0, %vm623_vm15 }
 0x334   : > { %v619_v38 = vsub.f32 1.0, %v618_v47 }
 0x336   : > { %v620_v50 = vmul.f32 %v832_v45, %v619_v38 }
 0x338   : > { %v621_v52 = vadd.f32 %v832_v45, %v620_v50 }
 0x33a   : > { %v625_v55 = vsel %vm624_vm1, %v832_v45, %v621_v52 }
 0x33b   : > { %v630_v58 = vsel %vm627_vm2, %v629_v54, %v625_v55 }
 0x33c   : > { %v631_v27 = vmul.f32 %v830_v39, %v630_v58 }
 0x33e   : > { %765 = vmatmul.msk.f32.vlgmr.msra.gmra.mxu2 %vm494_vm8, %v631_v27 }
 0x3c1   : > { %v652_v60 = vpop.f32.mrf.mxu2 }
 0x3c2   : > { %v655_v49 = vadd.f32 %v652_v60, %v1148_v57 }
 0x3c4   : > { %656 = vst.msk [vmem:[%s257_s16] sm:$0xff] %vm580_vm14, %v655_v49 }
 0x3c5   : > { %860 = shalt.err (!%p857_p3)
}
 0x3c6   : > { %783 = dma.vmem_to_hbm [thread:$0]  (%p977_p5), %s671_s17, 128, %s673_s18, %s658_s19  }
 0x3c7 PF: > { %p789_p4 = scmp.ge.s32.totalorder %s895_s24, 2  ;;  %s684_s9 = sand.u32 1, %s883_s21  }
 0x3c8   : > { %s685_s11 = scalar_lea.sflag [#allocation3], %s684_s9 }
 0x3c9   : > { %p786_p7 = pnand %p789_p4, %p981_p6 }
 0x3cb   : > { %p787_p8 = pneg %p786_p7 }
 0x3cd   : > { %878 = dma.done.wait (%p787_p8), %s685_s11, 128  }
 0x3ce   : > { %880 = vsyncadd (%p787_p8), %s685_s11, 4294967168  ;;  %p16_p9 = scmp.ge.s32.totalorder %s964_s27, 4   ;;  %s1213_s21 = smov %s887_s22 }
 0x3cf   : > { %s1214_s22 = smov %s891_s23  ;;  %s1215_s23 = smov %s975_s30 }
 0x3d0   : > { %s1216_s24 = smov %s964_s27  ;;  %18 = sbr.rel (!%p16_p9) target bundleno = 3 (0x3), region = 82 }
 0x3d5   :  { %691 = vsyncpa [#allocation3], 1 }
 0x3d6   :  { %693 = vsyncpa [#allocation3 + $0x1], 1 }

</bundles_post_ra>
